<compile_context>
chip_gen: v7x
topology: tpu7x:2x2x1
jax: 0.10.0
libtpu: 0.0.40
codegen_flags: <defaults>
</compile_context>

<pallas_src>
import jax
import jax.numpy as jnp
from jax import lax
from jax.experimental import pallas as pl
from jax.experimental.pallas import tpu as pltpu

LANES = 128
MAX_TILE_ROWS = 2048   # (2048,128) f32 tile = 1 MiB; 2 inputs x 2 buffers = 4 MiB VMEM
NUM_SPLITS = 2         # leading parallel axis -> both TensorCores on v7x


def _cdiv(a, b):
    return (a + b - 1) // b


def _round_up(a, b):
    return _cdiv(a, b) * b


def _make_kernel(tile_rows, rows, blocks_per_split, needs_mask):
    """Build the reduction kernel with all tiling constants baked in statically."""

    def kernel(x_ref, y_ref, o_ref):
        i = pl.program_id(1)

        # Zero the resident per-core partial on the first step of the reduction axis.
        @pl.when(i == 0)
        def _():
            o_ref[...] = jnp.zeros_like(o_ref)

        d = x_ref[...].astype(jnp.float32) - y_ref[...].astype(jnp.float32)
        sq = d * d

        if needs_mask:
            # Mask rows that lie past the real data (partial last tile and/or the
            # duplicated block used to keep the grid rectangular across cores).
            blk = pl.program_id(0) * blocks_per_split + i
            row_ids = lax.broadcasted_iota(jnp.int32, (tile_rows, LANES), 0) + blk * tile_rows
            sq = jnp.where(row_ids < rows, sq, 0.0)

        # Fold tile_rows rows into a vreg-shaped (8, LANES) partial: the reshape keeps
        # the (8,128) tiling intact, so this is pure elementwise vreg adds on the VPU
        # (no per-step cross-lane reduction).
        o_ref[...] += jnp.sum(sq.reshape(tile_rows // 8, 8, LANES), axis=0)

    return kernel


def euclidean_loss(inputs, targets):
    assert inputs.shape == targets.shape, "inputs/targets must have identical shapes"

    # Flatten: a reshape of a contiguous array is free (no HBM copy).
    x = jnp.ravel(inputs)
    y = jnp.ravel(targets)
    n = x.shape[0]

    rows = n // LANES
    tail = n - rows * LANES

    if rows == 0:
        # Tiny input (< 128 elements): not worth a kernel launch.
        d = x.astype(jnp.float32) - y.astype(jnp.float32)
        return jnp.sqrt(jnp.sum(d * d))

    # Sublane multiple required by the narrowest input dtype (f32->8, bf16->16, int8->32).
    min_itemsize = min(jnp.dtype(x.dtype).itemsize, jnp.dtype(y.dtype).itemsize)
    sub_mult = max(8, 32 // max(min_itemsize, 1))

    tile_rows = min(MAX_TILE_ROWS, _round_up(rows, sub_mult))
    num_blocks = _cdiv(rows, tile_rows)
    num_splits = NUM_SPLITS if num_blocks >= NUM_SPLITS else 1
    blocks_per_split = _cdiv(num_blocks, num_splits)
    # Mask needed if the last tile is partial or a block is duplicated across cores.
    needs_mask = (num_splits * blocks_per_split * tile_rows) != rows

    # Bulk view [rows, 128] in native dtype. If there is no tail this is a pure
    # reshape; otherwise only a contiguous prefix slice (no pad, no upcast).
    if tail:
        x_bulk = x[: rows * LANES]
        y_bulk = y[: rows * LANES]
    else:
        x_bulk = x
        y_bulk = y
    x2 = x_bulk.reshape(rows, LANES)
    y2 = y_bulk.reshape(rows, LANES)

    if num_splits * blocks_per_split > num_blocks:
        # Keep the grid rectangular: clamp the duplicated block index (its data is
        # fully masked inside the kernel).
        def in_map(c, i):
            return (jnp.minimum(c * blocks_per_split + i, num_blocks - 1), 0)
    else:
        def in_map(c, i):
            return (c * blocks_per_split + i, 0)

    kernel = _make_kernel(tile_rows, rows, blocks_per_split, needs_mask)

    partials = pl.pallas_call(
        kernel,
        out_shape=jax.ShapeDtypeStruct((num_splits, 8, LANES), jnp.float32),
        grid_spec=pltpu.PrefetchScalarGridSpec(
            num_scalar_prefetch=0,
            grid=(num_splits, blocks_per_split),
            in_specs=[
                pl.BlockSpec((tile_rows, LANES), in_map),
                pl.BlockSpec((tile_rows, LANES), in_map),
            ],
            # One resident (8,128) partial-sum block per core; leading dim squeezed.
            out_specs=pl.BlockSpec((None, 8, LANES), lambda c, i: (c, 0, 0)),
        ),
        compiler_params=pltpu.CompilerParams(
            dimension_semantics=("parallel", "arbitrary"),
        ),
    )(x2, y2)

    # Single cross-lane reduce over the tiny per-core partials, plus the <128-element
    # tail (if any), then the scalar sqrt.
    ss = jnp.sum(partials)
    if tail:
        xt = x[rows * LANES:].astype(jnp.float32)
        yt = y[rows * LANES:].astype(jnp.float32)
        ss = ss + jnp.sum((xt - yt) ** 2)
    return jnp.sqrt(ss)


if __name__ == "__main__":
    key = jax.random.PRNGKey(0)
    k1, k2 = jax.random.split(key)
    # Small NCHW-shaped example inputs (layout is irrelevant to this loss).
    shape = (2, 4, 16, 16)
    inputs = jax.random.normal(k1, shape, dtype=jnp.float32)
    targets = jax.random.normal(k2, shape, dtype=jnp.float32)

    loss_fn = jax.jit(euclidean_loss)
    loss = loss_fn(inputs, targets)
    jax.block_until_ready(loss)

    # Reference check in plain JAX.
    ref = jnp.sqrt(jnp.sum((inputs - targets) ** 2))
    assert jnp.allclose(loss, ref, rtol=1e-5, atol=1e-5), (loss, ref)

    print("KERNEL_OK")
</pallas_src>

<mosaic_0001>
module attributes {stable_mosaic.version = 11 : i64} {
  func.func @kernel(%arg0: i32, %arg1: i32, %arg2: memref<16x128xf32, #tpu.memory_space<vmem>>, %arg3: memref<16x128xf32, #tpu.memory_space<vmem>>, %arg4: memref<1x8x128xf32, #tpu.memory_space<vmem>>) attributes {dimension_semantics = [#tpu.dimension_semantics<parallel>, #tpu.dimension_semantics<arbitrary>], iteration_bounds = array<i64: 1, 1>, scalar_prefetch = 0 : i64, scratch_operands = 0 : i64, tpu.core_type = #tpu.core_type<tc>, window_params = [{transform_indices = @transform_0, window_bounds = array<i64: 16, 128>}, {transform_indices = @transform_1, window_bounds = array<i64: 16, 128>}, {transform_indices = @transform_2, window_bounds = array<i64: 1, 8, 128>}]} {
    %c0_i32 = arith.constant 0 : i32
    %0 = arith.cmpi eq, %arg1, %c0_i32 : i32
    %1 = arith.extui %0 : i1 to i32
    %c0_i32_0 = arith.constant 0 : i32
    %2 = arith.cmpi ne, %1, %c0_i32_0 : i32
    scf.if %2 {
      %cst_10 = arith.constant 0.000000e+00 : f32
      %15 = vector.broadcast %cst_10 : f32 to vector<8x128xf32>
      %c0_11 = arith.constant 0 : index
      %c0_12 = arith.constant 0 : index
      %c0_13 = arith.constant 0 : index
      %16 = vector.load %arg4[%c0_11, %c0_12, %c0_13] : memref<1x8x128xf32, #tpu.memory_space<vmem>>, vector<1x8x128xf32>
      %17 = vector.shape_cast %16 : vector<1x8x128xf32> to vector<8x128xf32>
      %18 = vector.shape_cast %15 : vector<8x128xf32> to vector<1x8x128xf32>
      tpu.vector_store %arg4[%c0_11, %c0_12, %c0_13], %18 {strides = array<i32>} : memref<1x8x128xf32, #tpu.memory_space<vmem>>, vector<1x8x128xf32>,
    } else {
    }
    %c0 = arith.constant 0 : index
    %c0_1 = arith.constant 0 : index
    %3 = vector.load %arg2[%c0, %c0_1] : memref<16x128xf32, #tpu.memory_space<vmem>>, vector<16x128xf32>
    %c0_2 = arith.constant 0 : index
    %c0_3 = arith.constant 0 : index
    %4 = vector.load %arg3[%c0_2, %c0_3] : memref<16x128xf32, #tpu.memory_space<vmem>>, vector<16x128xf32>
    %5 = arith.subf %3, %4 : vector<16x128xf32>
    %6 = arith.mulf %5, %5 : vector<16x128xf32>
    %c0_4 = arith.constant 0 : index
    %c0_5 = arith.constant 0 : index
    %c0_6 = arith.constant 0 : index
    %7 = vector.load %arg4[%c0_4, %c0_5, %c0_6] : memref<1x8x128xf32, #tpu.memory_space<vmem>>, vector<1x8x128xf32>
    %8 = vector.shape_cast %7 : vector<1x8x128xf32> to vector<8x128xf32>
    %9 = vector.shape_cast %6 : vector<16x128xf32> to vector<2x8x128xf32>
    %cst = arith.constant dense<0.000000e+00> : vector<8x128xf32>
    %10 = vector.multi_reduction <add>, %9, %cst [0] : vector<2x8x128xf32> to vector<8x128xf32>
    %11 = arith.addf %8, %10 : vector<8x128xf32>
    %c0_7 = arith.constant 0 : index
    %c0_8 = arith.constant 0 : index
    %c0_9 = arith.constant 0 : index
    %12 = vector.load %arg4[%c0_7, %c0_8, %c0_9] : memref<1x8x128xf32, #tpu.memory_space<vmem>>, vector<1x8x128xf32>
    %13 = vector.shape_cast %12 : vector<1x8x128xf32> to vector<8x128xf32>
    %14 = vector.shape_cast %11 : vector<8x128xf32> to vector<1x8x128xf32>
    tpu.vector_store %arg4[%c0_7, %c0_8, %c0_9], %14 {strides = array<i32>} : memref<1x8x128xf32, #tpu.memory_space<vmem>>, vector<1x8x128xf32>,
    return
  }
  func.func @transform_0(%arg0: i32, %arg1: i32) -> (i32, i32) {
    %c1_i32 = arith.constant 1 : i32
    %0 = arith.muli %arg0, %c1_i32 : i32
    %1 = arith.addi %0, %arg1 : i32
    %c0_i32 = arith.constant 0 : i32
    %c0_i32_0 = arith.constant 0 : i32
    return %1, %c0_i32 : i32, i32
  }
  func.func @transform_1(%arg0: i32, %arg1: i32) -> (i32, i32) {
    %c1_i32 = arith.constant 1 : i32
    %0 = arith.muli %arg0, %c1_i32 : i32
    %1 = arith.addi %0, %arg1 : i32
    %c0_i32 = arith.constant 0 : i32
    %c0_i32_0 = arith.constant 0 : i32
    return %1, %c0_i32 : i32, i32
  }
  func.func @transform_2(%arg0: i32, %arg1: i32) -> (i32, i32, i32) {
    %c0_i32 = arith.constant 0 : i32
    %c0_i32_0 = arith.constant 0 : i32
    %c0_i32_1 = arith.constant 0 : i32
    return %arg0, %c0_i32, %c0_i32_0 : i32, i32, i32
  }
}

</mosaic_0001>

<bundles_post_ra>
// kernel: euclidean_loss.1
= control target key start
LH: loop header
LB: loop body
LE: loop exit
PB: predicated region body
PF: predicated region fallthrough
CT: control target
= control target key end

     0   :  { %s119_s0 = inlined_call_operand.vmem [shape: f32[16,128], index: 0, kind: input, shape index: {}]   ;;  %s120_s1 = inlined_call_operand.vmem [shape: f32[16,128], index: 1, kind: input, shape index: {}]   ;;  %s121_s2 = inlined_call_operand.vmem [shape: f32[1,8,128], index: 2, kind: output, shape index: {}]  }
   0x1   :  { %v60_v0 = vld [vmem:[%s119_s0] sm:$0xff]  ;;  %v61_v1 = vld [vmem:[%s119_s0 + $0x8] sm:$0xff] }
   0x2   :  { %v62_v2 = vld [vmem:[%s120_s1] sm:$0xff]  ;;  %v63_v3 = vld [vmem:[%s120_s1 + $0x8] sm:$0xff] }
   0x3   :  { %v64_v4 = vsub.f32 %v60_v0, %v62_v2  ;;  %v65_v5 = vsub.f32 %v61_v1, %v63_v3 }
   0x5   :  { %v66_v6 = vmul.f32 %v64_v4, %v64_v4  ;;  %v67_v7 = vmul.f32 %v65_v5, %v65_v5 }
   0x7   :  { %v69_v8 = vadd.f32 %v67_v7, %v66_v6 }
   0x9   :  { %71 = vst [vmem:[%s121_s2] sm:$0xff] %v69_v8 }

</bundles_post_ra>
